<compile_context>
chip_gen: v5e
topology: v5e:2x2
jax: 0.10.0
libtpu: 0.0.40
codegen_flags: <defaults>
</compile_context>

<pallas_src>
import functools

import jax
import jax.numpy as jnp
from jax.experimental import pallas as pl
from jax.experimental.pallas import tpu as pltpu

HIDDEN = 128
OUT_DIM = 2


def _round_up(n, m):
    return ((n + m - 1) // m) * m


def policy_net_kernel(x_ref, w1_ref, b1_ref, w2t_ref, b2_ref, out_ref):
    x = x_ref[...]                        # [TB, obs_dim] f32
    w1 = w1_ref[...]                      # [obs_dim, 128] f32
    obs_dim = w1_ref.shape[0]

    # --- Layer 1: tiny-K contraction as unrolled VPU broadcast-FMAs (f32),
    #     with b1 folded into the accumulator init.
    acc = x[:, 0:1] * w1[0:1, :] + b1_ref[...]              # [TB, 128]
    for k in range(1, obs_dim):                             # static unroll (K small)
        acc = acc + x[:, k:k + 1] * w1[k:k + 1, :]
    h = jnp.maximum(acc, 0.0)                               # ReLU, full 128 lanes

    # --- Layer 2: two logits as f32 multiplies + cross-lane reductions (XLU).
    w2t = w2t_ref[...]                                      # [2, 128] f32
    l0 = jnp.sum(h * w2t[0:1, :], axis=-1, keepdims=True)   # [TB, 1]
    l1 = jnp.sum(h * w2t[1:2, :], axis=-1, keepdims=True)   # [TB, 1]

    # Place the two logits into lanes 0/1 of the narrow output via lane-select
    # (plain VPU broadcast + select; avoids any minor-dim concatenate).
    lane = jax.lax.broadcasted_iota(jnp.int32, (l0.shape[0], OUT_DIM), 1)
    logits = jnp.where(lane == 0, l0, l1) + b2_ref[...]     # [TB, 2]
    out_ref[...] = logits.astype(out_ref.dtype)


@functools.partial(jax.jit, static_argnames=("block_b",))
def policy_network_forward(x, w1, b1, w2t, b2, *, block_b=8192):
    """x: [B, obs_dim]; w1: [obs_dim, 128]; b1: [1, 128]; w2t: [2, 128]; b2: [1, 2]."""
    B, obs_dim = x.shape
    hidden = w1.shape[1]
    out_dim = w2t.shape[0]

    # Batch tile: multiple of 8 sublanes; >= 2 grid steps whenever B > 8 so the
    # "parallel" batch axis can shard across TensorCores (v7x megacore).
    b8 = _round_up(B, 8)
    if b8 <= 8:
        tb = 8
    else:
        tb = min(block_b, _round_up((b8 + 1) // 2, 8))
    b_pad = _round_up(B, tb)
    x_p = x if b_pad == B else jnp.pad(x, ((0, b_pad - B), (0, 0)))

    out = pl.pallas_call(
        policy_net_kernel,
        out_shape=jax.ShapeDtypeStruct((b_pad, out_dim), jnp.float32),
        grid_spec=pltpu.PrefetchScalarGridSpec(
            num_scalar_prefetch=0,
            grid=(b_pad // tb,),
            in_specs=[
                pl.BlockSpec((tb, obs_dim), lambda i: (i, 0)),       # x tile
                pl.BlockSpec((obs_dim, hidden), lambda i: (0, 0)),   # w1 resident
                pl.BlockSpec((1, hidden), lambda i: (0, 0)),         # b1 resident
                pl.BlockSpec((out_dim, hidden), lambda i: (0, 0)),   # w2^T resident
                pl.BlockSpec((1, out_dim), lambda i: (0, 0)),        # b2 resident
            ],
            out_specs=pl.BlockSpec((tb, out_dim), lambda i: (i, 0)),
        ),
        compiler_params=pltpu.CompilerParams(
            dimension_semantics=("parallel",),
            vmem_limit_bytes=32 * 1024 * 1024,
        ),
    )(x_p, w1, b1, w2t, b2)

    return out[:B]


def init_params(key, obs_dim, hidden=HIDDEN, out_dim=OUT_DIM):
    """Deterministic init mimicking nn.Linear's U(-1/sqrt(fan_in), 1/sqrt(fan_in)).

    Emits kernel-ready layouts so nothing needs reshaping/padding per call:
      w1: [obs_dim, hidden] (transpose of PyTorch), b1: [1, hidden]
      w2t: [out_dim, hidden] (PyTorch's native [out, in]), b2: [1, out_dim]
    """
    k1, k2, k3, k4 = jax.random.split(key, 4)
    bound1 = 1.0 / jnp.sqrt(obs_dim)
    bound2 = 1.0 / jnp.sqrt(hidden)
    w1 = jax.random.uniform(k1, (obs_dim, hidden), jnp.float32, -bound1, bound1)
    b1 = jax.random.uniform(k2, (1, hidden), jnp.float32, -bound1, bound1)
    w2t = jax.random.uniform(k3, (out_dim, hidden), jnp.float32, -bound2, bound2)
    b2 = jax.random.uniform(k4, (1, out_dim), jnp.float32, -bound2, bound2)
    return w1, b1, w2t, b2


def _reference(x, w1, b1, w2t, b2):
    hi = jax.lax.Precision.HIGHEST
    h = jnp.maximum(jnp.dot(x, w1, precision=hi) + b1, 0.0)
    return jnp.dot(h, w2t.T, precision=hi) + b2


if __name__ == "__main__":
    key = jax.random.PRNGKey(0)
    obs_dim = 4      # CartPole observation space
    kx, kp, kx2 = jax.random.split(key, 3)
    params = init_params(kp, obs_dim)

    # Small smoke test (single grid step).
    batch = 8
    x = jax.random.normal(kx, (batch, obs_dim), dtype=jnp.float32)
    out = jax.block_until_ready(policy_network_forward(x, *params))
    ref = _reference(x, *params)
    assert out.shape == (batch, 2)
    assert jnp.allclose(out, ref, atol=1e-4, rtol=1e-4)   # full f32 path

    # Larger batch exercising the batch grid + padding of a partial last tile.
    batch2 = 1000
    x2 = jax.random.normal(kx2, (batch2, obs_dim), dtype=jnp.float32)
    out2 = jax.block_until_ready(
        policy_network_forward(x2, *params, block_b=256))
    ref2 = _reference(x2, *params)
    assert out2.shape == (batch2, 2)
    assert jnp.allclose(out2, ref2, atol=1e-4, rtol=1e-4)

    print("KERNEL_OK")
</pallas_src>

<mosaic_0001>
module attributes {stable_mosaic.version = 11 : i64} {
  func.func @policy_net_kernel(%arg0: i32, %arg1: memref<8x4xf32, #tpu.memory_space<vmem>>, %arg2: memref<4x128xf32, #tpu.memory_space<vmem>>, %arg3: memref<1x128xf32, #tpu.memory_space<vmem>>, %arg4: memref<2x128xf32, #tpu.memory_space<vmem>>, %arg5: memref<1x2xf32, #tpu.memory_space<vmem>>, %arg6: memref<8x2xf32, #tpu.memory_space<vmem>>) attributes {dimension_semantics = [#tpu.dimension_semantics<parallel>], iteration_bounds = array<i64: 1>, scalar_prefetch = 0 : i64, scratch_operands = 0 : i64, tpu.core_type = #tpu.core_type<tc>, window_params = [{transform_indices = @transform_0, window_bounds = array<i64: 8, 4>}, {pipeline_mode = #tpu.pipeline_mode<synchronous>, transform_indices = @transform_1, window_bounds = array<i64: 4, 128>}, {pipeline_mode = #tpu.pipeline_mode<synchronous>, transform_indices = @transform_2, window_bounds = array<i64: 1, 128>}, {pipeline_mode = #tpu.pipeline_mode<synchronous>, transform_indices = @transform_3, window_bounds = array<i64: 2, 128>}, {pipeline_mode = #tpu.pipeline_mode<synchronous>, transform_indices = @transform_4, window_bounds = array<i64: 1, 2>}, {transform_indices = @transform_5, window_bounds = array<i64: 8, 2>}]} {
    %c0 = arith.constant 0 : index
    %c0_0 = arith.constant 0 : index
    %0 = vector.load %arg1[%c0, %c0_0] : memref<8x4xf32, #tpu.memory_space<vmem>>, vector<8x4xf32>
    %c0_1 = arith.constant 0 : index
    %c0_2 = arith.constant 0 : index
    %1 = vector.load %arg2[%c0_1, %c0_2] : memref<4x128xf32, #tpu.memory_space<vmem>>, vector<4x128xf32>
    %2 = vector.extract_strided_slice %0 {offsets = [0, 0], sizes = [8, 1], strides = [1, 1]} : vector<8x4xf32> to vector<8x1xf32>
    %3 = vector.extract_strided_slice %1 {offsets = [0, 0], sizes = [1, 128], strides = [1, 1]} : vector<4x128xf32> to vector<1x128xf32>
    %4 = vector.broadcast %2 : vector<8x1xf32> to vector<8x128xf32>
    %5 = vector.broadcast %3 : vector<1x128xf32> to vector<8x128xf32>
    %6 = arith.mulf %4, %5 : vector<8x128xf32>
    %c0_3 = arith.constant 0 : index
    %c0_4 = arith.constant 0 : index
    %7 = vector.load %arg3[%c0_3, %c0_4] : memref<1x128xf32, #tpu.memory_space<vmem>>, vector<1x128xf32>
    %8 = vector.broadcast %7 : vector<1x128xf32> to vector<8x128xf32>
    %9 = arith.addf %6, %8 : vector<8x128xf32>
    %10 = vector.extract_strided_slice %0 {offsets = [0, 1], sizes = [8, 1], strides = [1, 1]} : vector<8x4xf32> to vector<8x1xf32>
    %11 = vector.extract_strided_slice %1 {offsets = [1, 0], sizes = [1, 128], strides = [1, 1]} : vector<4x128xf32> to vector<1x128xf32>
    %12 = vector.broadcast %10 : vector<8x1xf32> to vector<8x128xf32>
    %13 = vector.broadcast %11 : vector<1x128xf32> to vector<8x128xf32>
    %14 = arith.mulf %12, %13 : vector<8x128xf32>
    %15 = arith.addf %9, %14 : vector<8x128xf32>
    %16 = vector.extract_strided_slice %0 {offsets = [0, 2], sizes = [8, 1], strides = [1, 1]} : vector<8x4xf32> to vector<8x1xf32>
    %17 = vector.extract_strided_slice %1 {offsets = [2, 0], sizes = [1, 128], strides = [1, 1]} : vector<4x128xf32> to vector<1x128xf32>
    %18 = vector.broadcast %16 : vector<8x1xf32> to vector<8x128xf32>
    %19 = vector.broadcast %17 : vector<1x128xf32> to vector<8x128xf32>
    %20 = arith.mulf %18, %19 : vector<8x128xf32>
    %21 = arith.addf %15, %20 : vector<8x128xf32>
    %22 = vector.extract_strided_slice %0 {offsets = [0, 3], sizes = [8, 1], strides = [1, 1]} : vector<8x4xf32> to vector<8x1xf32>
    %23 = vector.extract_strided_slice %1 {offsets = [3, 0], sizes = [1, 128], strides = [1, 1]} : vector<4x128xf32> to vector<1x128xf32>
    %24 = vector.broadcast %22 : vector<8x1xf32> to vector<8x128xf32>
    %25 = vector.broadcast %23 : vector<1x128xf32> to vector<8x128xf32>
    %26 = arith.mulf %24, %25 : vector<8x128xf32>
    %27 = arith.addf %21, %26 : vector<8x128xf32>
    %cst = arith.constant 0.000000e+00 : f32
    %28 = vector.broadcast %cst : f32 to vector<8x128xf32>
    %29 = arith.maximumf %27, %28 : vector<8x128xf32>
    %c0_5 = arith.constant 0 : index
    %c0_6 = arith.constant 0 : index
    %30 = vector.load %arg4[%c0_5, %c0_6] : memref<2x128xf32, #tpu.memory_space<vmem>>, vector<2x128xf32>
    %31 = vector.extract_strided_slice %30 {offsets = [0, 0], sizes = [1, 128], strides = [1, 1]} : vector<2x128xf32> to vector<1x128xf32>
    %32 = vector.broadcast %31 : vector<1x128xf32> to vector<8x128xf32>
    %33 = arith.mulf %29, %32 : vector<8x128xf32>
    %cst_7 = arith.constant dense<0.000000e+00> : vector<8xf32>
    %34 = vector.multi_reduction <add>, %33, %cst_7 [1] : vector<8x128xf32> to vector<8xf32>
    %35 = vector.shape_cast %34 : vector<8xf32> to vector<8x1xf32>
    %36 = vector.extract_strided_slice %30 {offsets = [1, 0], sizes = [1, 128], strides = [1, 1]} : vector<2x128xf32> to vector<1x128xf32>
    %37 = vector.broadcast %36 : vector<1x128xf32> to vector<8x128xf32>
    %38 = arith.mulf %29, %37 : vector<8x128xf32>
    %cst_8 = arith.constant dense<0.000000e+00> : vector<8xf32>
    %39 = vector.multi_reduction <add>, %38, %cst_8 [1] : vector<8x128xf32> to vector<8xf32>
    %40 = vector.shape_cast %39 : vector<8xf32> to vector<8x1xf32>
    %41 = tpu.iota {dimensions = array<i32: 1>} : vector<8x2xi32>
    %c0_i32 = arith.constant 0 : i32
    %42 = vector.broadcast %c0_i32 : i32 to vector<8x2xi32>
    %43 = arith.cmpi eq, %41, %42 : vector<8x2xi32>
    %44 = vector.shape_cast %35 : vector<8x1xf32> to vector<8x1xf32>
    %45 = vector.broadcast %44 : vector<8x1xf32> to vector<8x2xf32>
    %46 = vector.shape_cast %40 : vector<8x1xf32> to vector<8x1xf32>
    %47 = vector.broadcast %46 : vector<8x1xf32> to vector<8x2xf32>
    %48 = arith.select %43, %45, %47 : vector<8x2xi1>, vector<8x2xf32>
    %c0_9 = arith.constant 0 : index
    %c0_10 = arith.constant 0 : index
    %49 = vector.load %arg5[%c0_9, %c0_10] : memref<1x2xf32, #tpu.memory_space<vmem>>, vector<1x2xf32>
    %50 = vector.broadcast %49 : vector<1x2xf32> to vector<8x2xf32>
    %51 = arith.addf %48, %50 : vector<8x2xf32>
    %c0_11 = arith.constant 0 : index
    %c0_12 = arith.constant 0 : index
    %52 = vector.load %arg6[%c0_11, %c0_12] : memref<8x2xf32, #tpu.memory_space<vmem>>, vector<8x2xf32>
    tpu.vector_store %arg6[%c0_11, %c0_12], %51 {strides = array<i32>} : memref<8x2xf32, #tpu.memory_space<vmem>>, vector<8x2xf32>,
    return
  }
  func.func @transform_0(%arg0: i32) -> (i32, i32) {
    %c0_i32 = arith.constant 0 : i32
    %c0_i32_0 = arith.constant 0 : i32
    return %arg0, %c0_i32 : i32, i32
  }
  func.func @transform_1(%arg0: i32) -> (i32, i32) {
    %c0_i32 = arith.constant 0 : i32
    %c0_i32_0 = arith.constant 0 : i32
    %c0_i32_1 = arith.constant 0 : i32
    return %c0_i32, %c0_i32_0 : i32, i32
  }
  func.func @transform_2(%arg0: i32) -> (i32, i32) {
    %c0_i32 = arith.constant 0 : i32
    %c0_i32_0 = arith.constant 0 : i32
    %c0_i32_1 = arith.constant 0 : i32
    return %c0_i32, %c0_i32_0 : i32, i32
  }
  func.func @transform_3(%arg0: i32) -> (i32, i32) {
    %c0_i32 = arith.constant 0 : i32
    %c0_i32_0 = arith.constant 0 : i32
    %c0_i32_1 = arith.constant 0 : i32
    return %c0_i32, %c0_i32_0 : i32, i32
  }
  func.func @transform_4(%arg0: i32) -> (i32, i32) {
    %c0_i32 = arith.constant 0 : i32
    %c0_i32_0 = arith.constant 0 : i32
    %c0_i32_1 = arith.constant 0 : i32
    return %c0_i32, %c0_i32_0 : i32, i32
  }
  func.func @transform_5(%arg0: i32) -> (i32, i32) {
    %c0_i32 = arith.constant 0 : i32
    %c0_i32_0 = arith.constant 0 : i32
    return %arg0, %c0_i32 : i32, i32
  }
}

</mosaic_0001>

<bundles_post_ra>
// kernel: policy_network_forward.1
= control target key start
LH: loop header
LB: loop body
LE: loop exit
PB: predicated region body
PF: predicated region fallthrough
CT: control target
= control target key end

     0   :  { %v91_v0 = vmov 0   ;;  %v92_v2 = vmov 2   ;;  %v93_v3 = vmov 1   ;;  %v94_v4 = vmov 3   ;;  %s143_s0 = inlined_call_operand.vmem [shape: f32[8,4], index: 0, kind: input, shape index: {}]   ;;  %s144_s2 = inlined_call_operand.vmem [shape: f32[1,128], index: 2, kind: input, shape index: {}]   ;;  %s145_s1 = inlined_call_operand.vmem [shape: f32[4,128], index: 1, kind: input, shape index: {}]   ;;  %s146_s4 = inlined_call_operand.vmem [shape: f32[1,2], index: 4, kind: input, shape index: {}]   ;;  %s147_s3 = inlined_call_operand.vmem [shape: f32[2,128], index: 3, kind: input, shape index: {}]   ;;  %s148_s5 = inlined_call_operand.vmem [shape: f32[8,2], index: 5, kind: output, shape index: {}]  }
   0x1   :  { %84 = vset.pattern.permute.xlu0 %v91_v0  ;;  %v20_v1 = vld [vmem:[%s143_s0] sm:$0xff]  ;;  %86 = vset.pattern.permute.xlu1 %v92_v2  ;;  %v65_v29 = vlaneseq  ;;  %vm74_vm1 = vcmask 15360  }
   0x2   :  { %24 = vperm.xlu0 %84, %v20_v1   ;;  %42 = vperm.xlu1 %86, %v20_v1   ;;  %v21_v5 = vld [vmem:[%s145_s1] sm:$0xf] }
   0x3   :  { %v27_v8 = vperm.slane %v21_v5, 0  ;;  %v89_v9 = vld [vmem:[%s144_s2] ss:$0 sm:$0xff]  ;;  %v38_v11 = vperm.slane %v21_v5, 1  ;;  %v45_v12 = vperm.slane %v21_v5, 2  ;;  %v52_v13 = vperm.slane %v21_v5, 3 }
   0x4   :  { %v56_v21 = vld [vmem:[%s147_s3] sm:$0x3]  ;;  %v66_v31 = vand.u32 127, %v65_v29 }
   0x5   :  { %v57_v24 = vperm.slane %v56_v21, 0  ;;  %v61_v27 = vperm.slane %v56_v21, 1  ;;  %v90_v32 = vld [vmem:[%s146_s4] ss:$0 sm:$0xff] }
   0x6   :  { %vm67_vm0 = vcmp.eq.s32.totalorder %v66_v31, 0 }
   0xa   :  { %85 = vset.pattern.permute.xlu0 %v93_v3  ;;  %87 = vset.pattern.permute.xlu1 %v94_v4 }
   0xb   :  { %35 = vperm.xlu0 %85, %v20_v1   ;;  %49 = vperm.xlu1 %87, %v20_v1  }
  0x13   :  { %88 = vset.pattern.permute.xlu0 %v94_v4 }
  0x74   :  { %v25_v6 = vpop.permute.xlu0 %24  ;;  %v43_v7 = vpop.permute.xlu1 %42 }
  0x75   :  { %v28_v10 = vmul.f32 %v27_v8, %v25_v6  ;;  %v46_v18 = vmul.f32 %v45_v12, %v43_v7 }
  0x77   :  { %v33_v16 = vadd.f32 %v89_v9, %v28_v10 }
  0x7d   :  { %v36_v14 = vpop.permute.xlu0 %35  ;;  %v50_v15 = vpop.permute.xlu1 %49 }
  0x7e   :  { %v39_v17 = vmul.f32 %v38_v11, %v36_v14  ;;  %v53_v20 = vmul.f32 %v52_v13, %v50_v15 }
  0x80   :  { %v40_v19 = vadd.f32 %v39_v17, %v33_v16 }
  0x82   :  { %v47_v22 = vadd.f32 %v46_v18, %v40_v19 }
  0x84   :  { %v54_v23 = vadd.f32 %v53_v20, %v47_v22 }
  0x86   :  { %v55_v25 = vmax.f32 %v54_v23, 0.0 }
  0x88   :  { %v58_v26 = vmul.f32 %v57_v24, %v55_v25  ;;  %v62_v28 = vmul.f32 %v61_v27, %v55_v25 }
  0x8a   :  { %59 = vadd.xlane.f32.xlu2 %v58_v26 }
  0x92   :  { %63 = vadd.xlane.f32.xlu2 %v62_v28 }
  0xfd   :  { %v60_v30 = vpop.xlane.xlu2 %59 }
 0x105   :  { %v64_v33 = vpop.xlane.xlu2 %63 }
 0x106   :  { %v68_v34 = vsel %vm67_vm0, %v60_v30, %v64_v33 }
 0x107   :  { %v73_v35 = vadd.f32 %v90_v32, %v68_v34 }
 0x109   :  { %75 = vst.msk [vmem:[%s148_s5] sm:$0xff] %vm74_vm1, %v73_v35 }

</bundles_post_ra>
